<compile_context>
chip_gen: v7x
topology: tpu7x:2x2x1
jax: 0.10.0
libtpu: 0.0.40
codegen_flags: <defaults>
</compile_context>

<pallas_src>
import math

import jax
import jax.numpy as jnp
from jax import lax
from jax.experimental import pallas as pl
from jax.experimental.pallas import tpu as pltpu

NEG_INF = -1e30  # large finite negative; causal rows always keep the diagonal
_MIB = 1024 * 1024


def _qkv_proj_kernel(x_ref, w_ref, b_ref, q_ref, k_ref, v_ref):
    """Grid (B, S_tiles, H).

    Views: x (blk, E) bf16; w (H, E, 3D) bf16 RESIDENT; b (H, 1, 3D) f32
    RESIDENT; q/k/v out blocks (blk, D).
    """
    h = pl.program_id(2)
    d = q_ref.shape[-1]
    # Single fused matmul per head: [Q*scale | K | V] columns.
    y = jnp.dot(x_ref[...], w_ref[h], preferred_element_type=jnp.float32)
    y = y + b_ref[h]                                  # (blk, 3D) f32
    q_ref[...] = y[:, :d].astype(q_ref.dtype)
    k_ref[...] = y[:, d:2 * d].astype(k_ref.dtype)
    v_ref[...] = y[:, 2 * d:].astype(v_ref.dtype)
    # TODO(synk): for head_dim < 128 the q/k/v stores end in D lanes (masked
    # stores); a (B,H,D,S) pre-transposed K layout would be lane-dense but the
    # (8,128) block constraint forbids it at the tiny self-test shapes.


def _flash_attn_kernel(qi_tab_ref, ki_tab_ref, q_ref, k_ref, v_ref,
                       wo_ref, bo_ref, o_ref, m_scr, l_scr, acc_scr):
    """Triangular grid (B, T): only causal (qi, ki<=qi) tile pairs exist.

    Views: q/k/v (H, blk, D) bf16; wo (H, D, E) bf16 resident; bo (1, E) f32;
    out (blk, E).  qi/ki come from SMEM scalar-prefetch lookup tables.
    """
    t = pl.program_id(1)
    qi = qi_tab_ref[t]
    ki = ki_tab_ref[t]

    @pl.when(ki == 0)
    def _init():
        m_scr[...] = jnp.full(m_scr.shape, NEG_INF, m_scr.dtype)
        l_scr[...] = jnp.zeros(l_scr.shape, l_scr.dtype)
        acc_scr[...] = jnp.zeros(acc_scr.shape, acc_scr.dtype)

    def _update(apply_mask):
        # Batched-over-heads QK^T on the MXU, f32 accumulation.
        s = jnp.einsum('hqd,hkd->hqk', q_ref[...], k_ref[...],
                       preferred_element_type=jnp.float32)          # (H,tq,tk)
        if apply_mask:
            # Diagonal tile only; tq == tk and tiles are aligned, so the
            # tile-local iota comparison equals the global causal condition.
            row = lax.broadcasted_iota(jnp.int32, s.shape, 1)
            col = lax.broadcasted_iota(jnp.int32, s.shape, 2)
            s = jnp.where(col <= row, s, NEG_INF)
        m_prev = m_scr[...]
        m_new = jnp.maximum(m_prev, jnp.max(s, axis=-1, keepdims=True))
        alpha = jnp.exp(m_prev - m_new)
        p = jnp.exp(s - m_new)                                        # f32
        l_scr[...] = alpha * l_scr[...] + jnp.sum(p, axis=-1, keepdims=True)
        acc_scr[...] = alpha * acc_scr[...] + jnp.einsum(
            'hqk,hkd->hqd', p.astype(v_ref.dtype), v_ref[...],
            preferred_element_type=jnp.float32)
        m_scr[...] = m_new

    @pl.when(ki < qi)   # strictly below the causal diagonal: no mask needed
    def _off_diag():
        _update(apply_mask=False)

    @pl.when(ki == qi)  # diagonal tile: mask, then finalize + fused out-proj
    def _diag():
        _update(apply_mask=True)
        inv_l = pl.reciprocal(l_scr[...], approx=True)                # (H,tq,1)
        attn = (acc_scr[...] * inv_l).astype(wo_ref.dtype)            # (H,tq,D)
        # Per-head accumulation: H sequential (tq,D)@(D,E) MXU matmuls summed
        # into one (tq,E) f32 value -> no (H,tq,E) intermediate.
        n_heads = wo_ref.shape[0]
        out = jnp.dot(attn[0], wo_ref[0], preferred_element_type=jnp.float32)
        for h in range(1, n_heads):
            out = out + jnp.dot(attn[h], wo_ref[h],
                                preferred_element_type=jnp.float32)
        o_ref[...] = (out + bo_ref[...]).astype(o_ref.dtype)


def masked_self_attention(x, params, *, num_heads, blk=None,
                          mxu_dtype=jnp.bfloat16):
    """x: (B, S, E) f32.  params: pre-transposed (E,E) weights, (1,E) biases."""
    B, S, E = x.shape
    H = num_heads
    assert E % H == 0
    D = E // H
    if blk is None:
        blk = next((c for c in (256, 128, 64, 32, 16, 8) if S % c == 0), S)
    assert S % blk == 0, "seq_len must be divisible by the tile size"
    n_tiles = S // blk
    scale = 1.0 / math.sqrt(D)

    # ---- wrapper-side weight re-layout (free, outside the kernels) ----------
    def head_w(w):   # (E_in, E_out) -> (H, E_in, D)
        return jnp.transpose(w.reshape(E, H, D), (1, 0, 2))

    def head_b(b):   # (1, E) -> (H, 1, D)
        return jnp.transpose(b.reshape(1, H, D), (1, 0, 2))

    # Fused per-head QKV weight [Wq*scale | Wk | Wv] -> (H, E, 3D) bf16.
    w_qkv = jnp.concatenate(
        [head_w(params["wq"]) * scale, head_w(params["wk"]),
         head_w(params["wv"])], axis=-1).astype(mxu_dtype)
    b_qkv = jnp.concatenate(
        [head_b(params["bq"]) * scale, head_b(params["bk"]),
         head_b(params["bv"])], axis=-1).astype(jnp.float32)         # (H,1,3D)
    wo = params["wo"].reshape(H, D, E).astype(mxu_dtype)             # (H, D, E)
    bo = params["bo"].astype(jnp.float32)                            # (1, E)
    x_in = x.astype(mxu_dtype)
    out_itemsize = jnp.dtype(x.dtype).itemsize

    def vmem_limit(nbytes):
        # Footprint + headroom; 32 MiB floor (v5e default is only 16 MiB),
        # 64 MiB ceiling so the setting is safe on v7x as well.
        return int(min(max(nbytes + 4 * _MIB, 32 * _MIB), 64 * _MIB))

    # ---- stage 1: fused QKV projection, resident weights, heads grid axis ---
    s1_bytes = (2 * blk * E * 2            # x tile (double-buffered, bf16)
                + 2 * H * E * 3 * D * 2    # resident fused weight (x2 buffers)
                + 2 * H * 3 * D * 4        # resident fused bias
                + 3 * 2 * blk * D * 2)     # q/k/v out tiles
    qkv_shape = jax.ShapeDtypeStruct((B, H, S, D), mxu_dtype)
    qkv_out_spec = pl.BlockSpec((pl.Squeezed(), pl.Squeezed(), blk, D),
                                lambda b, si, h: (b, h, si, 0))
    q, k, v = pl.pallas_call(
        _qkv_proj_kernel,
        out_shape=(qkv_shape, qkv_shape, qkv_shape),
        grid_spec=pltpu.PrefetchScalarGridSpec(
            num_scalar_prefetch=0,
            grid=(B, n_tiles, H),
            in_specs=[
                pl.BlockSpec((pl.Squeezed(), blk, E),
                             lambda b, si, h: (b, si, 0)),           # x
                pl.BlockSpec((H, E, 3 * D), lambda b, si, h: (0, 0, 0)),  # W
                pl.BlockSpec((H, 1, 3 * D), lambda b, si, h: (0, 0, 0)),  # bias
            ],
            out_specs=(qkv_out_spec, qkv_out_spec, qkv_out_spec),
        ),
        compiler_params=pltpu.CompilerParams(
            dimension_semantics=("parallel", "parallel", "arbitrary"),
            vmem_limit_bytes=vmem_limit(s1_bytes)),
    )(x_in, w_qkv, b_qkv)

    # ---- stage 2: flash attention on a triangular (causal) grid -------------
    qi_list, ki_list = [], []
    for qi in range(n_tiles):
        for ki in range(qi + 1):
            qi_list.append(qi)
            ki_list.append(ki)
    n_steps = len(qi_list)                     # n_tiles*(n_tiles+1)//2
    qi_tab = jnp.asarray(qi_list, jnp.int32)
    ki_tab = jnp.asarray(ki_list, jnp.int32)

    qkv_block = (pl.Squeezed(), H, blk, D)
    s2_bytes = (3 * 2 * H * blk * D * 2        # q/k/v tiles (double-buffered)
                + 2 * H * D * E * 2            # resident Wo (x2 buffers)
                + 2 * E * 4                    # resident bo
                + 2 * blk * E * out_itemsize   # output tile
                + 2 * H * blk * 4              # m, l scratch
                + H * blk * D * 4)             # acc scratch
    out = pl.pallas_call(
        _flash_attn_kernel,
        out_shape=jax.ShapeDtypeStruct((B, S, E), x.dtype),
        grid_spec=pltpu.PrefetchScalarGridSpec(
            num_scalar_prefetch=2,             # qi_tab, ki_tab -> SMEM
            grid=(B, n_steps),
            in_specs=[
                pl.BlockSpec(qkv_block, lambda b, t, qt, kt: (b, 0, qt[t], 0)),
                pl.BlockSpec(qkv_block, lambda b, t, qt, kt: (b, 0, kt[t], 0)),
                pl.BlockSpec(qkv_block, lambda b, t, qt, kt: (b, 0, kt[t], 0)),
                pl.BlockSpec((H, D, E), lambda b, t, qt, kt: (0, 0, 0)),  # Wo
                pl.BlockSpec((1, E), lambda b, t, qt, kt: (0, 0)),        # bo
            ],
            out_specs=pl.BlockSpec((pl.Squeezed(), blk, E),
                                   lambda b, t, qt, kt: (b, qt[t], 0)),
            scratch_shapes=[
                pltpu.VMEM((H, blk, 1), jnp.float32),   # running max
                pltpu.VMEM((H, blk, 1), jnp.float32),   # running sum
                pltpu.VMEM((H, blk, D), jnp.float32),   # output accumulator
            ],
        ),
        compiler_params=pltpu.CompilerParams(
            dimension_semantics=("parallel", "arbitrary"),
            vmem_limit_bytes=vmem_limit(s2_bytes)),
    )(qi_tab, ki_tab, q, k, v, wo, bo)
    return out


def _reference(x, params, num_heads):
    """Plain-JAX f32 reference matching the PyTorch forward."""
    B, S, E = x.shape
    D = E // num_heads

    def lin(t, w, b):
        return t @ w + b[0]

    q = lin(x, params["wq"], params["bq"]).reshape(B, S, num_heads, D).transpose(0, 2, 1, 3)
    k = lin(x, params["wk"], params["bk"]).reshape(B, S, num_heads, D).transpose(0, 2, 1, 3)
    v = lin(x, params["wv"], params["bv"]).reshape(B, S, num_heads, D).transpose(0, 2, 1, 3)
    s = jnp.einsum("bhqd,bhkd->bhqk", q, k) / math.sqrt(D)
    mask = jnp.tril(jnp.ones((S, S)))
    s = jnp.where(mask == 0, -jnp.inf, s)
    w = jax.nn.softmax(s, axis=-1)
    o = jnp.einsum("bhqk,bhkd->bhqd", w, v).transpose(0, 2, 1, 3).reshape(B, S, E)
    return lin(o, params["wo"], params["bo"])


if __name__ == "__main__":
    key = jax.random.PRNGKey(0)

    # (B, S, E, H, blk): base small config + a tiled config that exercises the
    # triangular grid and the multi-tile online softmax.
    configs = [(2, 8, 32, 4, 8), (2, 32, 32, 4, 8)]
    for B, S, E, H, blk in configs:
        key, *ks = jax.random.split(key, 10)
        bound = 1.0 / math.sqrt(E)
        params = {
            "wq": jax.random.uniform(ks[0], (E, E), jnp.float32, -bound, bound),
            "bq": jax.random.uniform(ks[1], (1, E), jnp.float32, -bound, bound),
            "wk": jax.random.uniform(ks[2], (E, E), jnp.float32, -bound, bound),
            "bk": jax.random.uniform(ks[3], (1, E), jnp.float32, -bound, bound),
            "wv": jax.random.uniform(ks[4], (E, E), jnp.float32, -bound, bound),
            "bv": jax.random.uniform(ks[5], (1, E), jnp.float32, -bound, bound),
            "wo": jax.random.uniform(ks[6], (E, E), jnp.float32, -bound, bound),
            "bo": jax.random.uniform(ks[7], (1, E), jnp.float32, -bound, bound),
        }
        x = jax.random.normal(ks[8], (B, S, E), jnp.float32)

        out = jax.block_until_ready(
            masked_self_attention(x, params, num_heads=H, blk=blk))
        ref = _reference(x, params, H)
        # bf16 MXU operands (f32 accumulation) -> tolerance looser than pure f32.
        assert jnp.allclose(out, ref, atol=2e-2, rtol=2e-2), (
            f"mismatch vs reference for config {(B, S, E, H, blk)}")

    print("KERNEL_OK")
</pallas_src>

<mosaic_0001>
module attributes {stable_mosaic.version = 11 : i64} {
  func.func @_qkv_proj_kernel(%arg0: i32, %arg1: i32, %arg2: i32, %arg3: memref<1x8x32xbf16, #tpu.memory_space<vmem>>, %arg4: memref<4x32x24xbf16, #tpu.memory_space<vmem>>, %arg5: memref<4x1x24xf32, #tpu.memory_space<vmem>>, %arg6: memref<1x1x8x8xbf16, #tpu.memory_space<vmem>>, %arg7: memref<1x1x8x8xbf16, #tpu.memory_space<vmem>>, %arg8: memref<1x1x8x8xbf16, #tpu.memory_space<vmem>>) attributes {dimension_semantics = [#tpu.dimension_semantics<parallel>, #tpu.dimension_semantics<parallel>, #tpu.dimension_semantics<arbitrary>], iteration_bounds = array<i64: 2, 1, 4>, scalar_prefetch = 0 : i64, scratch_operands = 0 : i64, tpu.core_type = #tpu.core_type<tc>, window_params = [{transform_indices = @transform_0, window_bounds = array<i64: 1, 8, 32>}, {pipeline_mode = #tpu.pipeline_mode<synchronous>, transform_indices = @transform_1, window_bounds = array<i64: 4, 32, 24>}, {pipeline_mode = #tpu.pipeline_mode<synchronous>, transform_indices = @transform_2, window_bounds = array<i64: 4, 1, 24>}, {transform_indices = @transform_3, window_bounds = array<i64: 1, 1, 8, 8>}, {transform_indices = @transform_4, window_bounds = array<i64: 1, 1, 8, 8>}, {transform_indices = @transform_5, window_bounds = array<i64: 1, 1, 8, 8>}]} {
    %c0 = arith.constant 0 : index
    %c0_0 = arith.constant 0 : index
    %c0_1 = arith.constant 0 : index
    %0 = vector.load %arg3[%c0, %c0_0, %c0_1] : memref<1x8x32xbf16, #tpu.memory_space<vmem>>, vector<1x8x32xbf16>
    %1 = vector.shape_cast %0 : vector<1x8x32xbf16> to vector<8x32xbf16>
    %2 = arith.index_cast %arg2 : i32 to index
    %c0_2 = arith.constant 0 : index
    %c0_3 = arith.constant 0 : index
    %3 = vector.load %arg4[%2, %c0_2, %c0_3] : memref<4x32x24xbf16, #tpu.memory_space<vmem>>, vector<1x32x24xbf16>
    %4 = vector.shape_cast %3 : vector<1x32x24xbf16> to vector<32x24xbf16>
    %cst = arith.constant dense<0.000000e+00> : vector<8x24xf32>
    %5 = tpu.matmul %1, %4, %cst {dimension_numbers = #tpu.dot_dimension_numbers<[1], [0], [0], [1], [0, 0, 1, 1], [], []>} : vector<8x32xbf16>, vector<32x24xbf16>, vector<8x24xf32> -> vector<8x24xf32>
    %6 = arith.index_cast %arg2 : i32 to index
    %c0_4 = arith.constant 0 : index
    %c0_5 = arith.constant 0 : index
    %7 = vector.load %arg5[%6, %c0_4, %c0_5] : memref<4x1x24xf32, #tpu.memory_space<vmem>>, vector<1x1x24xf32>
    %8 = vector.shape_cast %7 : vector<1x1x24xf32> to vector<1x24xf32>
    %9 = vector.broadcast %8 : vector<1x24xf32> to vector<8x24xf32>
    %10 = arith.addf %5, %9 : vector<8x24xf32>
    %11 = vector.extract_strided_slice %10 {offsets = [0, 0], sizes = [8, 8], strides = [1, 1]} : vector<8x24xf32> to vector<8x8xf32>
    %12 = arith.truncf %11 : vector<8x8xf32> to vector<8x8xbf16>
    %c0_6 = arith.constant 0 : index
    %c0_7 = arith.constant 0 : index
    %c0_8 = arith.constant 0 : index
    %c0_9 = arith.constant 0 : index
    %13 = vector.load %arg6[%c0_6, %c0_7, %c0_8, %c0_9] : memref<1x1x8x8xbf16, #tpu.memory_space<vmem>>, vector<1x1x8x8xbf16>
    %14 = vector.shape_cast %13 : vector<1x1x8x8xbf16> to vector<8x8xbf16>
    %15 = vector.shape_cast %12 : vector<8x8xbf16> to vector<1x1x8x8xbf16>
    tpu.vector_store %arg6[%c0_6, %c0_7, %c0_8, %c0_9], %15 {strides = array<i32>} : memref<1x1x8x8xbf16, #tpu.memory_space<vmem>>, vector<1x1x8x8xbf16>,
    %16 = vector.extract_strided_slice %10 {offsets = [0, 8], sizes = [8, 8], strides = [1, 1]} : vector<8x24xf32> to vector<8x8xf32>
    %17 = arith.truncf %16 : vector<8x8xf32> to vector<8x8xbf16>
    %c0_10 = arith.constant 0 : index
    %c0_11 = arith.constant 0 : index
    %c0_12 = arith.constant 0 : index
    %c0_13 = arith.constant 0 : index
    %18 = vector.load %arg7[%c0_10, %c0_11, %c0_12, %c0_13] : memref<1x1x8x8xbf16, #tpu.memory_space<vmem>>, vector<1x1x8x8xbf16>
    %19 = vector.shape_cast %18 : vector<1x1x8x8xbf16> to vector<8x8xbf16>
    %20 = vector.shape_cast %17 : vector<8x8xbf16> to vector<1x1x8x8xbf16>
    tpu.vector_store %arg7[%c0_10, %c0_11, %c0_12, %c0_13], %20 {strides = array<i32>} : memref<1x1x8x8xbf16, #tpu.memory_space<vmem>>, vector<1x1x8x8xbf16>,
    %21 = vector.extract_strided_slice %10 {offsets = [0, 16], sizes = [8, 8], strides = [1, 1]} : vector<8x24xf32> to vector<8x8xf32>
    %22 = arith.truncf %21 : vector<8x8xf32> to vector<8x8xbf16>
    %c0_14 = arith.constant 0 : index
    %c0_15 = arith.constant 0 : index
    %c0_16 = arith.constant 0 : index
    %c0_17 = arith.constant 0 : index
    %23 = vector.load %arg8[%c0_14, %c0_15, %c0_16, %c0_17] : memref<1x1x8x8xbf16, #tpu.memory_space<vmem>>, vector<1x1x8x8xbf16>
    %24 = vector.shape_cast %23 : vector<1x1x8x8xbf16> to vector<8x8xbf16>
    %25 = vector.shape_cast %22 : vector<8x8xbf16> to vector<1x1x8x8xbf16>
    tpu.vector_store %arg8[%c0_14, %c0_15, %c0_16, %c0_17], %25 {strides = array<i32>} : memref<1x1x8x8xbf16, #tpu.memory_space<vmem>>, vector<1x1x8x8xbf16>,
    return
  }
  func.func @transform_0(%arg0: i32, %arg1: i32, %arg2: i32) -> (i32, i32, i32) {
    %c0_i32 = arith.constant 0 : i32
    %c0_i32_0 = arith.constant 0 : i32
    return %arg0, %arg1, %c0_i32 : i32, i32, i32
  }
  func.func @transform_1(%arg0: i32, %arg1: i32, %arg2: i32) -> (i32, i32, i32) {
    %c0_i32 = arith.constant 0 : i32
    %c0_i32_0 = arith.constant 0 : i32
    %c0_i32_1 = arith.constant 0 : i32
    %c0_i32_2 = arith.constant 0 : i32
    return %c0_i32, %c0_i32_0, %c0_i32_1 : i32, i32, i32
  }
  func.func @transform_2(%arg0: i32, %arg1: i32, %arg2: i32) -> (i32, i32, i32) {
    %c0_i32 = arith.constant 0 : i32
    %c0_i32_0 = arith.constant 0 : i32
    %c0_i32_1 = arith.constant 0 : i32
    %c0_i32_2 = arith.constant 0 : i32
    return %c0_i32, %c0_i32_0, %c0_i32_1 : i32, i32, i32
  }
  func.func @transform_3(%arg0: i32, %arg1: i32, %arg2: i32) -> (i32, i32, i32, i32) {
    %c0_i32 = arith.constant 0 : i32
    %c0_i32_0 = arith.constant 0 : i32
    return %arg0, %arg2, %arg1, %c0_i32 : i32, i32, i32, i32
  }
  func.func @transform_4(%arg0: i32, %arg1: i32, %arg2: i32) -> (i32, i32, i32, i32) {
    %c0_i32 = arith.constant 0 : i32
    %c0_i32_0 = arith.constant 0 : i32
    return %arg0, %arg2, %arg1, %c0_i32 : i32, i32, i32, i32
  }
  func.func @transform_5(%arg0: i32, %arg1: i32, %arg2: i32) -> (i32, i32, i32, i32) {
    %c0_i32 = arith.constant 0 : i32
    %c0_i32_0 = arith.constant 0 : i32
    return %arg0, %arg2, %arg1, %c0_i32 : i32, i32, i32, i32
  }
}

</mosaic_0001>

<bundles_post_ra>
// kernel: tpu_custom_call.1
= control target key start
LH: loop header
LB: loop body
LE: loop exit
PB: predicated region body
PF: predicated region fallthrough
CT: control target
= control target key end

     0   :  { %11 = vsyncpa [#allocation3], 0  ;;  %s1129_s0 = inlined_call_operand.vmem [shape: bf16[2,8,32], index: 0, kind: input, shape index: {}]   ;;  %s1130_s1 = inlined_call_operand.vmem [shape: bf16[4,32,24], index: 1, kind: input, shape index: {}]   ;;  %s1131_s2 = inlined_call_operand.vmem [shape: f32[4,1,24], index: 2, kind: input, shape index: {}]   ;;  %s1132_s3 = inlined_call_operand.hbm [shape: bf16[2,4,8,8], index: 3, kind: output, shape index: {0}]   ;;  %s1133_s4 = inlined_call_operand.hbm [shape: bf16[2,4,8,8], index: 4, kind: output, shape index: {1}]   ;;  %s1134_s5 = inlined_call_operand.hbm [shape: bf16[2,4,8,8], index: 5, kind: output, shape index: {2}]  }
   0x1   :  { %13 = vsyncpa [#allocation3 + $0x1], 0 }
   0x2   :  { %14 = vsyncpa [#allocation5], 0 }
   0x3   :  { %16 = vsyncpa [#allocation5 + $0x1], 0  ;;  %s895_s18 = smov 0   ;;  %s897_s19 = smov 0  }
   0x4   :  { %s899_s20 = smov 0   ;;  %s901_s21 = smov 0  }
   0x5   :  { %s903_s22 = smov 0   ;;  %s905_s23 = smov 0  }
   0x6   :  { %s907_s24 = smov 0   ;;  %s909_s25 = smov 0  }
   0x7 LB: > { %s1136_s26 = sadd.s32 4294967295, %s856_s25   ;;  %s1135_s27 = sadd.s32 4294967294, %s856_s25   ;;  %s856_s25 = sphi %s909_s25, %s22_s25   ;;  %s852_s24 = sphi %s907_s24, %s1151_s24   ;;  %s848_s23 = sphi %s905_s23, %s1150_s23   ;;  %s844_s22 = sphi %s903_s22, %s1149_s22   ;;  %s840_s21 = sphi %s901_s21, %s1148_s21   ;;  %s836_s20 = sphi %s899_s20, %s1147_s20   ;;  %s832_s19 = sphi %s897_s19, %s1146_s19   ;;  %s828_s18 = sphi %s895_s18, %s1145_s18  }
   0x8   : > { %s34_s28 = sadd.s32 1, %s848_s23  ;;  %s41_s29 = sadd.s32 1, %s852_s24 }
   0x9   : > { %p35_p0 = scmp.ge.s32.totalorder %s34_s28, 4  ;;  %p132_p1 = scmp.ne.s32.totalorder %s836_s20, %s832_s19 }
   0xa   : > { %p133_p2 = scmp.eq.s32.totalorder %s1136_s26, 7  ;;  %p138_p5 = scmp.ne.s32.totalorder %s832_s19, %s828_s18 }
   0xb   : > { %s1153_s28 = smov (%p35_p0, %s34_s28), 0  ;;  %s1155_s29 = smov (!%p35_p0, %s41_s29), %s852_s24 }
   0xc   : > { %s116_s30 = ssub.s32 %s848_s23, %s1153_s28  ;;  %p948_p3 = por %p133_p2, %p132_p1 }
   0xd   : > { %p43_p4 = scmp.ge.s32.totalorder %s1155_s29, 2  ;;  %p139_p6 = scmp.eq.s32.totalorder %s1135_s27, 7 }
   0xe   : > { %p579_p7 = scmp.ge.s32.totalorder %s856_s25, 1  ;;  %p233_p9 = scmp.lt.s32.totalorder %s856_s25, 9 }
   0xf   : > { %s1157_s29 = smov (%p43_p4, %s1155_s29), 0  ;;  %p959_p8 = por %p139_p6, %p138_p5 }
  0x10   : > { %s115_s8 = ssub.s32 %s852_s24, %s1157_s29  ;;  %s122_s9 = sadd.s32 1, %s836_s20 }
  0x11   : > { %s117_s10 = sor.u32 %s116_s30, %s115_s8  ;;  %p234_p10 = pnand %p579_p7, %p233_p9 }
  0x12   : > { %p120_p11 = scmp.eq.s32.totalorder %s117_s10, 0  ;;  %s602_s12 = sshll.u32 (!%p234_p10), %s840_s21, 4  ;;  %v858_v0 = vmov (!%p234_p10), 0.0   ;;  %vm859_vm0 = vmmov (!%p234_p10), 0   ;;  %vm309_vm1 = vcmask (!%p234_p10), 261120   ;;  %vm354_vm2 = vcmask (!%p234_p10), 60416  }
  0x13   : > { %237 = sbr.rel (%p234_p10) target bundleno = 401 (0x191), region = 32  ;;  %p273_p12 = scmp.lt.s32.totalorder (!%p234_p10), %s844_s22, 1  ;;  %607 = vmatprep.subr.bf16.mxu0 (!%p234_p10), %v858_v0  ;;  %611 = vmatprep.mubr.msk.bf16.mxu0 (!%p234_p10), %vm859_vm0, %v858_v0 }
  0x14   : > { %s968_s11 = scalar_select %p120_p11, %s836_s20, %s122_s9  }
  0x15   : > { %s284_s15 = scalar_lea.vmem (!%p234_p10), %s1130_s1, %s602_s12  ;;  %s256_s10 = sand.u32 (!%p234_p10), 1, %s832_s19  }
  0x16   : > { %v700_v1 = vld [vmem:[%s284_s15] sm:$0xff] (!%p234_p10)   ;;  %v701_v2 = vld [vmem:[%s284_s15 + $0x8] sm:$0xff] (!%p234_p10)   ;;  %s594_s12 = sshll.u32 (!%p234_p10), %s844_s22, 2  ;;  %s289_s27 = scalar_lea.vmem (!%p234_p10), %s1131_s2, %s840_s21 }
  0x17   : > { %608 = vmatpush3.bf16.msra.mxu0 (!%p234_p10), %v700_v1  ;;  %s985_s26 = sshll.u32 (!%p234_p10), %s256_s10, 2  ;;  %s390_s15 = sadd.s32 (!%p234_p10), %s840_s21, %s594_s12  ;;  %v586_v4 = vld [vmem:[%s289_s27] ss:$0 sm:$0xff] (!%p234_p10) }
  0x18   : > { %609 = vmatprep.subr.bf16.mxu0 (!%p234_p10), %v858_v0  ;;  %s860_s21 = smov (!%p234_p10), 120   ;;  %s368_s27 = scalar_lea.sflag (!%p234_p10), [#allocation3], %s256_s10 }
  0x19   : > { %s861_s13 = smov (!%p234_p10), [#allocation2]  }
  0x1a   : > { %s274_s16 = scalar_select %p273_p12, %s844_s22, 1 }
  0x1b   : > { %610 = vmatpush3.bf16.msra.mxu0 %v701_v2  ;;  %s706_s14 = sshll.u32 %s861_s13, 4  ;;  %s707_s14 = int_to_ptr.vmem [resolvable:$false] %s706_s14 }
  0x1c   : > { %s583_s17 = sshll.u32 %s274_s16, 2  ;;  %s988_s16 = sshll.u32 %s390_s15, 6 }
  0x1d   : > { %s279_s9 = scalar_lea.vmem %s1129_s0, %s583_s17  ;;  %s258_s17 = scalar_lea.vmem [#allocation2], %s985_s26 }
  0x1e   : > { %v281_v3 = vld [vmem:[%s279_s9] sm:$0xf]  ;;  %s394_s30 = sshll.u32 %s258_s17, 4  ;;  %s995_s9 = scalar_lea.hbm %s1132_s3, %s988_s16  ;;  %s997_s30 = int_to_ptr.vmem [resolvable:$true] %s394_s30 }
  0x1f   : > { %612 = vmatmul.mubr.msk.bf16.vlgmr.msra.gmra.mrb[0].mxu0 %vm309_vm1, %v281_v3  ;;  %s702_s12 = scalar_lea.vmem %s997_s30, 64  ;;  %s708_s15 = scalar_lea.vmem %s707_s14, 128 }
  0x20   : > { %p703_p13 = scmp.ne.s32.totalorder %s997_s30, %s702_s12  ;;  %p709_p2 = scmp.lt.s32.totalorder %s997_s30, %s707_s14 }
  0x21   : > { %p710_p4 = scmp.lt.s32.totalorder %s708_s15, %s702_s12 }
  0x22   : > { %p704_p0 = pnand %p703_p13, %p948_p3 }
  0x23   : > { %p711_p5 = por %p710_p4, %p709_p2 }
  0x24   : > { %p705_p1 = pneg %p704_p0 }
  0x26   : > { %p712_p6 = pnand %p711_p5, %p705_p1 }
  0xf2   : > { %v347_v5 = vpop.f32.mrb[0].mxu0 }
  0xf3   : > { %v348_v6 = vadd.f32 %v586_v4, %v347_v5  ;;  %v613_v7 = vpop.f32.mrb[1].mxu0 }
  0xf4   : > { %v350_v8 = vpop.f32.mrb[2].mxu0 }
  0xf5   : > { %v353_v9 = vpack.c.bf16 %v348_v6, %v348_v6  ;;  %v614_v10 = vpop.f32.mrb[3].mxu0 }
  0xf7   : > { %359 = vrot.lane.b32.xlu0 %v353_v9, %s860_s21  ;;  %355 = vst.msk [vmem:[%s258_s17] sm:$0xf] %vm354_vm2, %v353_v9 }
  0xf8   : > { %715 = shalt.err (!%p712_p6)
}
  0xf9   : > { %s716_s10 = scalar_lea.hbm %s995_s9, 64  ;;  %s720_s8 = scalar_lea.hbm %s1132_s3, 512 }
  0xfa   : > { %p717_p7 = scmp.ne.s32.totalorder %s995_s9, %s716_s10  ;;  %p721_p11 = scmp.lt.u32.totalorder %s995_s9, %s1132_s3 }
  0xfb   : > { %p722_p12 = scmp.lt.u32.totalorder %s720_s8, %s716_s10  ;;  %p724_p0 = scmp.lt.u32.totalorder %s716_s10, %s995_s9 }
  0xfc   : > { %p718_p9 = pnand %p717_p7, %p948_p3 }
  0xfd   : > { %p723_p13 = por %p722_p12, %p721_p11 }
  0xfe   : > { %p719_p10 = pneg %p718_p9 }
  0xff   : > { %p725_p1 = por %p724_p0, %p723_p13 }
 0x101   : > { %p726_p2 = pnand %p725_p1, %p719_p10 }
 0x103   : > { %729 = shalt.err (!%p726_p2)
}
 0x104   : > { %615 = dma.vmem_to_hbm [thread:$0]  (%p948_p3), %s997_s30, 64, %s995_s9, %s368_s27  }
 0x105   : > { %s862_s12 = smov 112   ;;  %s1140_s14 = sadd.s32 4294967295, %s856_s25  }
 0x106   : > { %363 = vrot.lane.b32.xlu0 %v353_v9, %s862_s12  ;;  %s1023_s15 = sand.u32 1, %s1140_s14   ;;  %s265_s10 = scalar_lea.vmem [#allocation4], %s985_s26 }
 0x107   : > { %s410_s17 = sshll.u32 %s265_s10, 4  ;;  %s1030_s21 = scalar_lea.hbm %s1133_s4, %s988_s16  ;;  %s1032_s17 = int_to_ptr.vmem [resolvable:$true] %s410_s17 }
 0x108   : > { %s1137_s30 = scalar_lea.vmem [#allocation6], %s985_s26  ;;  %s730_s13 = scalar_lea.vmem %s1032_s17, 64 }
 0x109   : > { %s1037_s9 = sshll.u32 %s1137_s30, 4  ;;  %p731_p4 = scmp.ne.s32.totalorder %s1032_s17, %s730_s13  ;;  %s1065_s9 = int_to_ptr.vmem [resolvable:$true] %s1037_s9 }
 0x10a   : > { %s863_s12 = smov [#allocation4]  }
 0x10b   : > { %p732_p5 = pnand %p731_p4, %p948_p3  ;;  %s734_s14 = sshll.u32 %s863_s12, 4  ;;  %s735_s14 = int_to_ptr.vmem [resolvable:$false] %s734_s14 }
 0x10c   : > { %s736_s22 = scalar_lea.vmem %s735_s14, 128  ;;  %p737_p7 = scmp.lt.s32.totalorder %s1032_s17, %s735_s14 }
 0x10d   : > { %p733_p6 = pneg %p732_p5  ;;  %p738_p9 = scmp.lt.s32.totalorder %s736_s22, %s730_s13 }
 0x10f   : > { %p739_p10 = por %p738_p9, %p737_p7 }
 0x111   : > { %p740_p11 = pnand %p739_p10, %p733_p6 }
 0x169   : > { %v360_v11 = vpop.permute.xlu0 %359 }
 0x16a   : > { %362 = vst.msk [vmem:[%s265_s10] sm:$0xf] %vm354_vm2, %v360_v11 }
 0x16b   : > { %743 = shalt.err (!%p740_p11)
}
 0x16c   : > { %s744_s10 = scalar_lea.hbm %s1030_s21, 64  ;;  %s748_s12 = scalar_lea.hbm %s1133_s4, 512 }
 0x16d   : > { %p745_p12 = scmp.ne.s32.totalorder %s1030_s21, %s744_s10  ;;  %p749_p1 = scmp.lt.u32.totalorder %s1030_s21, %s1133_s4 }
 0x16e   : > { %p750_p2 = scmp.lt.u32.totalorder %s748_s12, %s744_s10  ;;  %p752_p5 = scmp.lt.u32.totalorder %s744_s10, %s1030_s21 }
 0x16f   : > { %p746_p13 = pnand %p745_p12, %p948_p3 }
 0x170   : > { %p751_p4 = por %p750_p2, %p749_p1 }
 0x171   : > { %p747_p0 = pneg %p746_p13 }
 0x172   : > { %p753_p6 = por %p752_p5, %p751_p4 }
 0x174   : > { %p754_p7 = pnand %p753_p6, %p747_p0 }
 0x176   : > { %757 = shalt.err (!%p754_p7)
}
 0x177   : > { %s1141_s13 = scalar_lea.sflag [#allocation5], %s1023_s15  ;;  %s1071_s22 = scalar_lea.hbm %s1134_s5, %s988_s16 }
 0x178   : > { %616 = dma.vmem_to_hbm [thread:$0]  (%p948_p3), %s1032_s17, 64, %s1030_s21, %s1141_s13   ;;  %v364_v12 = vpop.permute.xlu0 %363 }
 0x179   : > { %s1142_s10 = scalar_lea.vmem [#allocation6], %s985_s26  ;;  %s758_s8 = scalar_lea.vmem %s1065_s9, 64 }
 0x17a   : > { %366 = vst.msk [vmem:[%s1142_s10] sm:$0xf] %vm354_vm2, %v364_v12  ;;  %p759_p9 = scmp.ne.s32.totalorder %s1065_s9, %s758_s8  ;;  %s864_s17 = smov [#allocation6]  }
 0x17b   : > { %s762_s21 = sshll.u32 %s864_s17, 4  ;;  %s763_s21 = int_to_ptr.vmem [resolvable:$false] %s762_s21 }
 0x17c   : > { %p760_p10 = pnand %p759_p9, %p948_p3  ;;  %s764_s12 = scalar_lea.vmem %s763_s21, 128 }
 0x17d   : > { %p765_p12 = scmp.lt.s32.totalorder %s1065_s9, %s763_s21  ;;  %p766_p13 = scmp.lt.s32.totalorder %s764_s12, %s758_s8 }
 0x17e   : > { %p761_p11 = pneg %p760_p10 }
 0x17f   : > { %p767_p0 = por %p766_p13, %p765_p12 }
 0x181   : > { %p768_p1 = pnand %p767_p0, %p761_p11 }
 0x183   : > { %771 = shalt.err (!%p768_p1)
}
 0x184   : > { %s772_s26 = scalar_lea.hbm %s1071_s22, 64  ;;  %s776_s13 = scalar_lea.hbm %s1134_s5, 512 }
 0x185   : > { %p773_p2 = scmp.ne.s32.totalorder %s1071_s22, %s772_s26  ;;  %p777_p6 = scmp.lt.u32.totalorder %s1071_s22, %s1134_s5 }
 0x186   : > { %p778_p7 = scmp.lt.u32.totalorder %s776_s13, %s772_s26  ;;  %p780_p10 = scmp.lt.u32.totalorder %s772_s26, %s1071_s22 }
 0x187   : > { %p774_p4 = pnand %p773_p2, %p948_p3 }
 0x188   : > { %p779_p9 = por %p778_p7, %p777_p6 }
 0x189   : > { %p775_p5 = pneg %p774_p4 }
 0x18a   : > { %p781_p11 = por %p780_p10, %p779_p9 }
 0x18c   : > { %p782_p12 = pnand %p781_p11, %p775_p5 }
 0x18e   : > { %785 = shalt.err (!%p782_p12)
}
 0x18f   : > { %s1143_s10 = scalar_lea.sflag [#allocation5], %s1023_s15 }
 0x190   : > { %617 = dma.vmem_to_hbm [thread:$0]  (%p948_p3), %s1065_s9, 64, %s1071_s22, %s1143_s10  }
 0x191 PF: > { %p631_p13 = scmp.ge.s32.totalorder %s856_s25, 2  ;;  %s438_s8 = sand.u32 1, %s828_s18  }
 0x192   : > { %s439_s17 = scalar_lea.sflag [#allocation3], %s438_s8 }
 0x193   : > { %p622_p0 = pnand %p631_p13, %p959_p8 }
 0x195   : > { %819 = dma.done.wait (!%p622_p0), %s439_s17, 64  }
 0x196   : > { %821 = vsyncadd (!%p622_p0), %s439_s17, 4294967232  ;;  %s1144_s21 = sadd.s32 4294967294, %s856_s25  }
 0x197   : > { %s447_s12 = sand.u32 1, %s1144_s21  }
 0x198   : > { %s448_s6 = scalar_lea.sflag [#allocation5], %s447_s12 }
 0x199   : > { %823 = dma.done.wait (!%p622_p0), %s448_s6, 128  }
 0x19a   : > { %825 = vsyncadd (!%p622_p0), %s448_s6, 4294967168  ;;  %s22_s25 = sadd.s32 1, %s856_s25   ;;  %s1145_s18 = smov %s832_s19 }
 0x19b   : > { %p19_p3 = scmp.ge.s32.totalorder %s22_s25, 10   ;;  %s1146_s19 = smov %s836_s20 }
 0x19c   : > { %s1147_s20 = smov %s968_s11  ;;  %s1148_s21 = smov %s848_s23 }
 0x19d   : > { %s1149_s22 = smov %s852_s24  ;;  %s1150_s23 = smov %s1153_s28 }
 0x19e   : > { %s1151_s24 = smov %s1157_s29  ;;  %21 = sbr.rel (!%p19_p3) target bundleno = 7 (0x7), region = 101 }
 0x1a5   :  { %462 = vsyncpa [#allocation3], 1 }
 0x1a6   :  { %464 = vsyncpa [#allocation3 + $0x1], 1 }
 0x1a7   :  { %465 = vsyncpa [#allocation5], 1 }
 0x1a8   :  { %467 = vsyncpa [#allocation5 + $0x1], 1 }

</bundles_post_ra>
